<compile_context>
chip_gen: v7x
topology: tpu7x:2x2x1
jax: 0.10.0
libtpu: 0.0.40
codegen_flags: <defaults>
</compile_context>

<pallas_src>
import jax
import jax.numpy as jnp
from jax.experimental import pallas as pl
from jax.experimental.pallas import tpu as pltpu


# ----------------------------- Pallas MLP kernel -----------------------------

def _point_mlp_kernel(x_ref, w1_ref, w2_ref, b_ref, o_ref):
    """PointRend head MLP over one lane tile of sampled points.

    x_ref : (C_in, TL)    bf16  point features; point index (b*N + n) on lanes
    w1_ref: (H, C_in)     bf16  first-layer weights (transposed)
    w2_ref: (Co_pad, H)   bf16  second-layer weights (transposed, rows padded)
    b_ref : (H+Co_pad, 1) f32   packed biases [b1 ; b2_pad]
    o_ref : (Co_pad, TL)  f32   lane-dense output tile
    """
    H = w1_ref.shape[0]
    b = b_ref[...]                                              # (H+Co_pad, 1)
    # first layer: one 16-channel bf16 slab -> one MXU matmul, f32 accumulation
    h = jnp.dot(w1_ref[...], x_ref[...],
                preferred_element_type=jnp.float32) + b[:H]
    h = jnp.maximum(h, 0.0)                                     # f32 ReLU (VPU)
    y = jnp.dot(w2_ref[...], h.astype(jnp.bfloat16),
                preferred_element_type=jnp.float32) + b[H:]
    o_ref[...] = y.astype(o_ref.dtype)                          # lane-dense vst


def point_mlp_pallas(x, w1, b1, w2, b2, *, lane_tile=512):
    """x: (C_in, L) bf16 channel-major point features, L = B*num_points on the
    lane axis.  Computes Linear(C_in, H) -> ReLU -> Linear(H, Co) per point.
    Returns (Co, L) f32."""
    C_in, L = x.shape
    H = w1.shape[1]
    Co = w2.shape[1]
    Co_pad = (Co + 7) // 8 * 8            # pad classes -> unmasked sublane stores

    # Lane tiling: a single step when small; >= lane_tile-wide tiles (marked
    # "parallel" -> shards over v7x's 2 TensorCores) once L grows.  tl is either
    # the full L or a multiple of 128, so lane stores stay unmasked.
    if L > lane_tile and L % lane_tile == 0:
        tl = lane_tile
    else:
        tl = L

    # Host-side weight prep: bf16 MXU operands, packed f32 bias, padded Co rows.
    w1t = w1.T.astype(jnp.bfloat16)                                   # (H, C_in)
    w2t = jnp.zeros((Co_pad, H), jnp.bfloat16).at[:Co].set(
        w2.T.astype(jnp.bfloat16))                                    # (Co_pad, H)
    b_pack = jnp.zeros((H + Co_pad, 1), jnp.float32)
    b_pack = b_pack.at[:H, 0].set(b1.astype(jnp.float32))
    b_pack = b_pack.at[H:H + Co, 0].set(b2.astype(jnp.float32))

    out = pl.pallas_call(
        _point_mlp_kernel,
        out_shape=jax.ShapeDtypeStruct((Co_pad, L), jnp.float32),
        grid_spec=pltpu.PrefetchScalarGridSpec(
            num_scalar_prefetch=0,
            grid=(L // tl,),
            in_specs=[
                pl.BlockSpec((C_in, tl), lambda t: (0, t)),        # features
                pl.BlockSpec((H, C_in), lambda t: (0, 0)),         # resident w1
                pl.BlockSpec((Co_pad, H), lambda t: (0, 0)),       # resident w2
                pl.BlockSpec((H + Co_pad, 1), lambda t: (0, 0)),   # packed bias
            ],
            out_specs=pl.BlockSpec((Co_pad, tl), lambda t: (0, t)),
        ),
        compiler_params=pltpu.CompilerParams(
            dimension_semantics=("parallel",)),                    # v7x 2-TC shard
    )(x, w1t, w2t, b_pack)
    return out[:Co]                                                # drop pad rows


# ------------------------------ JAX glue (sampling) --------------------------

def _bilinear_corners(points, H, W):
    """Corner indices + weights for grid_sample(bilinear, zeros, align_corners=False).
    points: (B, N, 2) in [0,1], last dim (x, y).  Returns flat indices (B,4,N)
    and weights (B,4,N) with out-of-bounds corners zero-weighted."""
    x = points[..., 0] * W - 0.5
    y = points[..., 1] * H - 0.5
    x0 = jnp.floor(x)
    y0 = jnp.floor(y)
    x1 = x0 + 1.0
    y1 = y0 + 1.0
    wx1 = x - x0
    wx0 = 1.0 - wx1
    wy1 = y - y0
    wy0 = 1.0 - wy1

    def corner(ix, iy, w):
        valid = (ix >= 0) & (ix <= W - 1) & (iy >= 0) & (iy <= H - 1)
        ixc = jnp.clip(ix, 0, W - 1).astype(jnp.int32)
        iyc = jnp.clip(iy, 0, H - 1).astype(jnp.int32)
        return iyc * W + ixc, w * valid.astype(w.dtype)          # zeros padding

    i00, w00 = corner(x0, y0, wx0 * wy0)
    i10, w10 = corner(x1, y0, wx1 * wy0)
    i01, w01 = corner(x0, y1, wx0 * wy1)
    i11, w11 = corner(x1, y1, wx1 * wy1)
    idx = jnp.stack([i00, i10, i01, i11], axis=1)                # (B, 4, N)
    wts = jnp.stack([w00, w10, w01, w11], axis=1)                # (B, 4, N)
    return idx, wts


def _gather_corners(inp, idx):
    """inp: (B, C, H, W); idx: (B, 4, N) flat indices -> (B, C, 4, N)."""
    B, C, H, W = inp.shape
    N = idx.shape[-1]
    flat = inp.reshape(B, C, H * W)
    idx_b = jnp.broadcast_to(idx.reshape(B, 1, 4 * N), (B, C, 4 * N))
    vals = jnp.take_along_axis(flat, idx_b, axis=2)              # one gather
    return vals.reshape(B, C, 4, N)


def point_sample(inp, points):
    """Batch-major (B, C, N) variant (used by sampling + verification).
    Equivalent of F.grid_sample(inp, 2*points-1, bilinear, zeros,
    align_corners=False) on (B, N, 2) points in [0,1]."""
    B, C, H, W = inp.shape
    idx, wts = _bilinear_corners(points.astype(jnp.float32), H, W)
    vals = _gather_corners(inp, idx)                             # (B, C, 4, N)
    return jnp.einsum('bcjn,bjn->bcn', vals.astype(jnp.float32), wts)


def point_sample_cm(inp, points):
    """Channel-major (C, B*N) variant feeding the kernel: einsum writes 'cbn'
    order directly and reshapes — no extra transpose materialized."""
    B, C, H, W = inp.shape
    N = points.shape[1]
    idx, wts = _bilinear_corners(points.astype(jnp.float32), H, W)
    vals = _gather_corners(inp, idx)                             # (B, C, 4, N)
    out = jnp.einsum('bcjn,bjn->cbn', vals.astype(jnp.float32), wts)
    return out.reshape(C, B * N)
    # TODO(synk): at realistic PointRend sizes, fuse this 4-corner gather into
    # the Pallas kernel (scalar-prefetched flat corner indices, feature maps in
    # memory_space=pl.ANY, manual make_async_copy + VPU weighted sum) to remove
    # the (B, C, 4, N) HBM intermediate — the biggest end-to-end lever.


def sampling_points_train(key, mask, N, k, beta):
    """Training-mode sampling_points: over-generate k*N random points, keep the
    beta*N most uncertain (top1 - top2 of the channel-sorted coarse prediction)
    plus (1-beta)*N uniform coverage points."""
    B, C, H, W = mask.shape
    mask_sorted = -jnp.sort(-mask, axis=1)                       # descending
    k1, k2 = jax.random.split(key)
    over_gen = jax.random.uniform(k1, (B, k * N, 2), dtype=jnp.float32)
    og_map = point_sample(mask_sorted, over_gen)                 # (B, C, k*N)
    uncertainty = -1.0 * (og_map[:, 0] - og_map[:, 1])           # (B, k*N)
    n_imp = int(beta * N)
    _, idx = jax.lax.top_k(uncertainty, n_imp)                   # (B, n_imp)
    importance = jnp.take_along_axis(over_gen, idx[..., None], axis=1)
    coverage = jax.random.uniform(k2, (B, N - n_imp, 2), dtype=jnp.float32)
    return jnp.concatenate([importance, coverage], axis=1)       # (B, N, 2)


# --------------------------------- PointHead ---------------------------------

class PointHeadPallas:
    def __init__(self, key, in_c=16, num_classes=4, hidden=32, k=3, beta=0.75,
                 num_points=128):
        # torch.nn.Linear-style init (uniform +/- 1/sqrt(fan_in))
        k1, k2, k3, k4 = jax.random.split(key, 4)
        s1 = 1.0 / jnp.sqrt(in_c)
        s2 = 1.0 / jnp.sqrt(hidden)
        self.w1 = jax.random.uniform(k1, (in_c, hidden), jnp.float32, -s1, s1)
        self.b1 = jax.random.uniform(k2, (hidden,), jnp.float32, -s1, s1)
        self.w2 = jax.random.uniform(k3, (hidden, num_classes), jnp.float32, -s2, s2)
        self.b2 = jax.random.uniform(k4, (num_classes,), jnp.float32, -s2, s2)
        self.k = k
        self.beta = beta
        self.num_points = num_points

    def __call__(self, key, fine, coarse):
        # training-mode forward (nn.Module default: self.training == True)
        B = coarse.shape[0]
        N = self.num_points
        points = sampling_points_train(key, coarse, N, self.k, self.beta)
        # One channel-major (Cc+Cf, B*N) bf16 slab: batch folded onto the lane
        # axis, concat is two fused slab writes, bf16 halves kernel DMA bytes.
        cs = point_sample_cm(coarse, points)                     # (Cc, B*N)
        fs = point_sample_cm(fine, points)                       # (Cf, B*N)
        x = jnp.concatenate([cs, fs], axis=0).astype(jnp.bfloat16)
        rend_flat = point_mlp_pallas(x, self.w1, self.b1, self.w2, self.b2)
        Co = rend_flat.shape[0]
        rend = rend_flat.reshape(Co, B, N).transpose(1, 0, 2)    # (B, Co, N)
        return {'rend': rend, 'points': points}
    # TODO(synk): eval-mode `inference` branch (dense top-k over the H*W grid +
    # scatter of rend back into the coarse map) is not wired up; it would reuse
    # the same Pallas MLP kernel with glue-side top_k / scatter.


# ----------------------------------- main ------------------------------------

if __name__ == "__main__":
    key = jax.random.PRNGKey(0)
    kp, kf, kc, ks = jax.random.split(key, 4)

    B = 2
    num_classes = 4          # coarse prediction channels == output classes
    fine_c = 12              # fine feature channels -> in_c = 16
    num_points = 128         # B*N = 256 lanes: single-step, fills 256-wide MXU
    coarse = jax.random.normal(kc, (B, num_classes, 8, 8), jnp.float32)
    fine = jax.random.normal(kf, (B, fine_c, 16, 16), jnp.float32)

    head = PointHeadPallas(kp, in_c=num_classes + fine_c, num_classes=num_classes,
                           hidden=32, k=3, beta=0.75, num_points=num_points)
    fwd = jax.jit(head.__call__)
    out = fwd(ks, fine, coarse)
    jax.block_until_ready(out)

    rend, points = out['rend'], out['points']
    assert rend.shape == (B, num_classes, num_points)
    assert points.shape == (B, num_points, 2)

    # --- verification -------------------------------------------------------
    cs = point_sample(coarse, points)                        # (B, Cc, N) f32
    fs = point_sample(fine, points)                          # (B, Cf, N) f32

    # matched-precision reference: same bf16 operand casts, f32 accumulation
    x_bf = jnp.concatenate([cs, fs], axis=1).astype(jnp.bfloat16)
    w1t_bf = head.w1.T.astype(jnp.bfloat16)
    w2t_bf = head.w2.T.astype(jnp.bfloat16)
    h = jnp.einsum('hc,bcn->bhn', w1t_bf, x_bf,
                   preferred_element_type=jnp.float32) + head.b1.reshape(1, -1, 1)
    h = jnp.maximum(h, 0.0)
    ref = (jnp.einsum('oh,bhn->bon', w2t_bf, h.astype(jnp.bfloat16),
                      preferred_element_type=jnp.float32)
           + head.b2.reshape(1, -1, 1))
    assert jnp.allclose(rend, ref, atol=1e-3, rtol=1e-3), \
        "Pallas MLP mismatch vs matched-precision reference"

    # loose check against the pure-f32 PyTorch-semantics MLP (bf16 operand error only)
    h32 = jnp.maximum(
        jnp.einsum('hc,bcn->bhn', head.w1.T, jnp.concatenate([cs, fs], axis=1))
        + head.b1.reshape(1, -1, 1), 0.0)
    ref32 = jnp.einsum('oh,bhn->bon', head.w2.T, h32) + head.b2.reshape(1, -1, 1)
    assert jnp.allclose(rend, ref32, atol=1e-1, rtol=1e-1), \
        "Pallas MLP far from f32 reference"

    print("KERNEL_OK")
</pallas_src>

<mosaic_0001>
module attributes {stable_mosaic.version = 11 : i64} {
  func.func @_point_mlp_kernel(%arg0: i32, %arg1: memref<16x256xbf16, #tpu.memory_space<vmem>>, %arg2: memref<32x16xbf16, #tpu.memory_space<vmem>>, %arg3: memref<8x32xbf16, #tpu.memory_space<vmem>>, %arg4: memref<40x1xf32, #tpu.memory_space<vmem>>, %arg5: memref<8x256xf32, #tpu.memory_space<vmem>>) attributes {dimension_semantics = [#tpu.dimension_semantics<parallel>], iteration_bounds = array<i64: 1>, scalar_prefetch = 0 : i64, scratch_operands = 0 : i64, tpu.core_type = #tpu.core_type<tc>, window_params = [{transform_indices = @transform_0, window_bounds = array<i64: 16, 256>}, {pipeline_mode = #tpu.pipeline_mode<synchronous>, transform_indices = @transform_1, window_bounds = array<i64: 32, 16>}, {pipeline_mode = #tpu.pipeline_mode<synchronous>, transform_indices = @transform_2, window_bounds = array<i64: 8, 32>}, {pipeline_mode = #tpu.pipeline_mode<synchronous>, transform_indices = @transform_3, window_bounds = array<i64: 40, 1>}, {transform_indices = @transform_4, window_bounds = array<i64: 8, 256>}]} {
    %c0 = arith.constant 0 : index
    %c0_0 = arith.constant 0 : index
    %0 = vector.load %arg4[%c0, %c0_0] : memref<40x1xf32, #tpu.memory_space<vmem>>, vector<40x1xf32>
    %c0_1 = arith.constant 0 : index
    %c0_2 = arith.constant 0 : index
    %1 = vector.load %arg2[%c0_1, %c0_2] : memref<32x16xbf16, #tpu.memory_space<vmem>>, vector<32x16xbf16>
    %c0_3 = arith.constant 0 : index
    %c0_4 = arith.constant 0 : index
    %2 = vector.load %arg1[%c0_3, %c0_4] : memref<16x256xbf16, #tpu.memory_space<vmem>>, vector<16x256xbf16>
    %cst = arith.constant dense<0.000000e+00> : vector<32x256xf32>
    %3 = tpu.matmul %1, %2, %cst {dimension_numbers = #tpu.dot_dimension_numbers<[1], [0], [0], [1], [0, 0, 1, 1], [], []>} : vector<32x16xbf16>, vector<16x256xbf16>, vector<32x256xf32> -> vector<32x256xf32>
    %4 = vector.extract_strided_slice %0 {offsets = [0, 0], sizes = [32, 1], strides = [1, 1]} : vector<40x1xf32> to vector<32x1xf32>
    %5 = vector.broadcast %4 : vector<32x1xf32> to vector<32x256xf32>
    %6 = arith.addf %3, %5 : vector<32x256xf32>
    %cst_5 = arith.constant 0.000000e+00 : f32
    %7 = vector.broadcast %cst_5 : f32 to vector<32x256xf32>
    %8 = arith.maximumf %6, %7 : vector<32x256xf32>
    %c0_6 = arith.constant 0 : index
    %c0_7 = arith.constant 0 : index
    %9 = vector.load %arg3[%c0_6, %c0_7] : memref<8x32xbf16, #tpu.memory_space<vmem>>, vector<8x32xbf16>
    %10 = arith.truncf %8 : vector<32x256xf32> to vector<32x256xbf16>
    %cst_8 = arith.constant dense<0.000000e+00> : vector<8x256xf32>
    %11 = tpu.matmul %9, %10, %cst_8 {dimension_numbers = #tpu.dot_dimension_numbers<[1], [0], [0], [1], [0, 0, 1, 1], [], []>} : vector<8x32xbf16>, vector<32x256xbf16>, vector<8x256xf32> -> vector<8x256xf32>
    %12 = vector.extract_strided_slice %0 {offsets = [32, 0], sizes = [8, 1], strides = [1, 1]} : vector<40x1xf32> to vector<8x1xf32>
    %13 = vector.broadcast %12 : vector<8x1xf32> to vector<8x256xf32>
    %14 = arith.addf %11, %13 : vector<8x256xf32>
    %c0_9 = arith.constant 0 : index
    %c0_10 = arith.constant 0 : index
    %15 = vector.load %arg5[%c0_9, %c0_10] : memref<8x256xf32, #tpu.memory_space<vmem>>, vector<8x256xf32>
    tpu.vector_store %arg5[%c0_9, %c0_10], %14 {strides = array<i32>} : memref<8x256xf32, #tpu.memory_space<vmem>>, vector<8x256xf32>,
    return
  }
  func.func @transform_0(%arg0: i32) -> (i32, i32) {
    %c0_i32 = arith.constant 0 : i32
    %c0_i32_0 = arith.constant 0 : i32
    return %c0_i32, %arg0 : i32, i32
  }
  func.func @transform_1(%arg0: i32) -> (i32, i32) {
    %c0_i32 = arith.constant 0 : i32
    %c0_i32_0 = arith.constant 0 : i32
    %c0_i32_1 = arith.constant 0 : i32
    return %c0_i32, %c0_i32_0 : i32, i32
  }
  func.func @transform_2(%arg0: i32) -> (i32, i32) {
    %c0_i32 = arith.constant 0 : i32
    %c0_i32_0 = arith.constant 0 : i32
    %c0_i32_1 = arith.constant 0 : i32
    return %c0_i32, %c0_i32_0 : i32, i32
  }
  func.func @transform_3(%arg0: i32) -> (i32, i32) {
    %c0_i32 = arith.constant 0 : i32
    %c0_i32_0 = arith.constant 0 : i32
    %c0_i32_1 = arith.constant 0 : i32
    return %c0_i32, %c0_i32_0 : i32, i32
  }
  func.func @transform_4(%arg0: i32) -> (i32, i32) {
    %c0_i32 = arith.constant 0 : i32
    %c0_i32_0 = arith.constant 0 : i32
    return %c0_i32, %arg0 : i32, i32
  }
}

</mosaic_0001>

<bundles_post_ra>
// kernel: neg.2
= control target key start
LH: loop header
LB: loop body
LE: loop exit
PB: predicated region body
PF: predicated region fallthrough
CT: control target
= control target key end

     0   :  { %s136_s0 = inlined_call_operand.vmem [shape: f32[2,4,8,8], index: 0, kind: input, shape index: {}]   ;;  %s137_s1 = inlined_call_operand.vmem [shape: f32[2,4,8,8], index: 1, kind: output, shape index: {}]  }
   0x1   :  { %v2_v0 = vld [vmem:[%s136_s0] sm:$0xff]  ;;  %v66_v2 = vld [vmem:[%s136_s0 + $0x8] sm:$0xff]  ;;  %v70_v7 = vld [vmem:[%s136_s0 + $0x10] sm:$0xff] }
   0x2   :  { %v64_v1 = vld [vmem:[%s136_s0 + $0x20] sm:$0xff]  ;;  %v5_v3 = vxor.u32 2147483648, %v2_v0  ;;  %v20_v5 = vxor.u32 2147483648, %v66_v2  ;;  %v68_v6 = vld [vmem:[%s136_s0 + $0x28] sm:$0xff]  ;;  %v72_v8 = vld [vmem:[%s136_s0 + $0x30] sm:$0xff]  ;;  %v36_v10 = vxor.u32 2147483648, %v70_v7 }
   0x3   :  { %v12_v4 = vxor.u32 2147483648, %v64_v1  ;;  %v28_v9 = vxor.u32 2147483648, %v68_v6  ;;  %v44_v11 = vxor.u32 2147483648, %v72_v8  ;;  %v74_v12 = vld [vmem:[%s136_s0 + $0x18] sm:$0xff] }
   0x4   :  { %v76_v13 = vld [vmem:[%s136_s0 + $0x38] sm:$0xff]  ;;  %7 = vst [vmem:[%s137_s1] sm:$0xff] %v5_v3  ;;  %67 = vst [vmem:[%s137_s1 + $0x8] sm:$0xff] %v20_v5  ;;  %v52_v14 = vxor.u32 2147483648, %v74_v12 }
   0x5   :  { %65 = vst [vmem:[%s137_s1 + $0x20] sm:$0xff] %v12_v4  ;;  %v60_v15 = vxor.u32 2147483648, %v76_v13  ;;  %69 = vst [vmem:[%s137_s1 + $0x28] sm:$0xff] %v28_v9 }
   0x6   :  { %71 = vst [vmem:[%s137_s1 + $0x10] sm:$0xff] %v36_v10  ;;  %73 = vst [vmem:[%s137_s1 + $0x30] sm:$0xff] %v44_v11 }
   0x7   :  { %75 = vst [vmem:[%s137_s1 + $0x18] sm:$0xff] %v52_v14  ;;  %77 = vst [vmem:[%s137_s1 + $0x38] sm:$0xff] %v60_v15 }

// kernel: neg.3
= control target key start
LH: loop header
LB: loop body
LE: loop exit
PB: predicated region body
PF: predicated region fallthrough
CT: control target
= control target key end

     0   :  { %s264_s0 = inlined_call_operand.vmem [shape: f32[2,4,8,8], index: 0, kind: input, shape index: {}]   ;;  %s265_s1 = inlined_call_operand.vmem [shape: f32[2,4,8,8], index: 1, kind: output, shape index: {}]  }
   0x1   :  { %v2_v0 = vld [vmem:[%s264_s0] sm:$0xf]  ;;  %v130_v2 = vld [vmem:[%s264_s0 + $0x4] sm:$0xf]  ;;  %v134_v8 = vld [vmem:[%s264_s0 + $0x8] sm:$0xf] }
   0x2   :  { %v128_v1 = vld [vmem:[%s264_s0 + $0x20] sm:$0xf]  ;;  %v5_v3 = vxor.u32 2147483648, %v2_v0  ;;  %v20_v5 = vxor.u32 2147483648, %v130_v2  ;;  %v132_v6 = vld [vmem:[%s264_s0 + $0x24] sm:$0xf] }
   0x3   :  { %v12_v4 = vxor.u32 2147483648, %v128_v1  ;;  %v28_v7 = vxor.u32 2147483648, %v132_v6  ;;  %v136_v9 = vld [vmem:[%s264_s0 + $0x28] sm:$0xf]  ;;  %v36_v10 = vxor.u32 2147483648, %v134_v8 }
   0x4   :  { %7 = vst [vmem:[%s265_s1] sm:$0xf] %v5_v3  ;;  %131 = vst [vmem:[%s265_s1 + $0x4] sm:$0xf] %v20_v5  ;;  %v44_v11 = vxor.u32 2147483648, %v136_v9  ;;  %v138_v12 = vld [vmem:[%s264_s0 + $0xc] sm:$0xf] }
   0x5   :  { %129 = vst [vmem:[%s265_s1 + $0x20] sm:$0xf] %v12_v4  ;;  %v140_v13 = vld [vmem:[%s264_s0 + $0x2c] sm:$0xf]  ;;  %133 = vst [vmem:[%s265_s1 + $0x24] sm:$0xf] %v28_v7 }
   0x6   :  { %v52_v14 = vxor.u32 2147483648, %v138_v12  ;;  %v60_v15 = vxor.u32 2147483648, %v140_v13  ;;  %v142_v16 = vld [vmem:[%s264_s0 + $0x10] sm:$0xf]  ;;  %135 = vst [vmem:[%s265_s1 + $0x8] sm:$0xf] %v36_v10 }
   0x7   :  { %v144_v17 = vld [vmem:[%s264_s0 + $0x30] sm:$0xf]  ;;  %137 = vst [vmem:[%s265_s1 + $0x28] sm:$0xf] %v44_v11  ;;  %v68_v18 = vxor.u32 2147483648, %v142_v16 }
   0x8   :  { %v76_v19 = vxor.u32 2147483648, %v144_v17  ;;  %v146_v20 = vld [vmem:[%s264_s0 + $0x14] sm:$0xf]  ;;  %139 = vst [vmem:[%s265_s1 + $0xc] sm:$0xf] %v52_v14 }
   0x9   :  { %v148_v21 = vld [vmem:[%s264_s0 + $0x34] sm:$0xf]  ;;  %141 = vst [vmem:[%s265_s1 + $0x2c] sm:$0xf] %v60_v15  ;;  %v84_v22 = vxor.u32 2147483648, %v146_v20 }
   0xa   :  { %v92_v23 = vxor.u32 2147483648, %v148_v21  ;;  %v150_v24 = vld [vmem:[%s264_s0 + $0x18] sm:$0xf]  ;;  %143 = vst [vmem:[%s265_s1 + $0x10] sm:$0xf] %v68_v18 }
   0xb   :  { %v152_v25 = vld [vmem:[%s264_s0 + $0x38] sm:$0xf]  ;;  %145 = vst [vmem:[%s265_s1 + $0x30] sm:$0xf] %v76_v19  ;;  %v100_v26 = vxor.u32 2147483648, %v150_v24 }
   0xc   :  { %v108_v27 = vxor.u32 2147483648, %v152_v25  ;;  %v154_v28 = vld [vmem:[%s264_s0 + $0x1c] sm:$0xf]  ;;  %147 = vst [vmem:[%s265_s1 + $0x14] sm:$0xf] %v84_v22 }
   0xd   :  { %v156_v29 = vld [vmem:[%s264_s0 + $0x3c] sm:$0xf]  ;;  %149 = vst [vmem:[%s265_s1 + $0x34] sm:$0xf] %v92_v23  ;;  %v116_v30 = vxor.u32 2147483648, %v154_v28 }
   0xe   :  { %v124_v31 = vxor.u32 2147483648, %v156_v29  ;;  %151 = vst [vmem:[%s265_s1 + $0x18] sm:$0xf] %v100_v26  ;;  %153 = vst [vmem:[%s265_s1 + $0x38] sm:$0xf] %v108_v27 }
   0xf   :  { %155 = vst [vmem:[%s265_s1 + $0x1c] sm:$0xf] %v116_v30 }
  0x10   :  { %157 = vst [vmem:[%s265_s1 + $0x3c] sm:$0xf] %v124_v31 }

// kernel: a_call__.1
= control target key start
LH: loop header
LB: loop body
LE: loop exit
PB: predicated region body
PF: predicated region fallthrough
CT: control target
= control target key end

     0   :  { %v213_v1 = vmov 0   ;;  %vm69_vm0 = vcmask 130048   ;;  %vm147_vm1 = vcmask 261120   ;;  %s275_s0 = inlined_call_operand.vmem [shape: bf16[16,256], index: 0, kind: input, shape index: {}]   ;;  %s276_s1 = inlined_call_operand.vmem [shape: bf16[32,16], index: 1, kind: input, shape index: {}]   ;;  %s277_s3 = inlined_call_operand.vmem [shape: f32[40,1], index: 3, kind: input, shape index: {}]   ;;  %s278_s2 = inlined_call_operand.vmem [shape: bf16[8,32], index: 2, kind: input, shape index: {}]   ;;  %s279_s4 = inlined_call_operand.vmem [shape: f32[8,256], index: 4, kind: output, shape index: {}]  }
   0x1   :  { %v208_v0 = vld [vmem:[%s275_s0 + $0x4] ss:$8 sps:$4 sm:$0xff]   ;;  %108 = vmatprep.mubr.bf16.mxu0 %v213_v1  ;;  %206 = vset.pattern.permute.xlu0 %v213_v1  ;;  %v210_v2 = vld [vmem:[%s275_s0] ss:$8 sps:$4 sm:$0xff]   ;;  %v20_v5 = vld [vmem:[%s277_s3 + $0x10] sm:$0xff] }
   0x2   :  { %207 = vset.pattern.permute.xlu1 %v213_v1  ;;  %183 = vmatprep.mubr.bf16.mxu1 %v213_v1  ;;  %v211_v3 = vld [vmem:[%s276_s1] sm:$0xff]   ;;  %v19_v6 = vld [vmem:[%s277_s3 + $0x8] sm:$0xff]  ;;  %v21_v7 = vld [vmem:[%s277_s3 + $0x18] sm:$0xff] }
   0x3   :  { %76 = vmatprep.subr.bf16.mxu0 %v208_v0  ;;  %v18_v4 = vld [vmem:[%s277_s3] sm:$0xff]  ;;  %41 = vperm.xlu1 %207, %v20_v5   ;;  %v212_v9 = vld [vmem:[%s276_s1 + $0x8] sm:$0xff]  }
   0x4   :  { %77 = vmatpush1.bf16.msra.mxu0 %v210_v2  ;;  %31 = vperm.xlu0 %206, %v18_v4   ;;  %v22_v8 = vld [vmem:[%s277_s3 + $0x20] sm:$0xff] }
   0x5   :  { %v137_v42 = vld [vmem:[%s278_s2] sm:$0xf] }
   0x7   :  { %202 = vmatmul.mubr.msk.bf16.vlgmr.msra.gmra.mrb[0].mxu0 %vm69_vm0, %v211_v3  ;;  %46 = vperm.xlu1 %207, %v21_v7  }
   0x8   :  { %118 = vmatprep.mubr.bf16.mxu0 %v213_v1  ;;  %36 = vperm.xlu0 %206, %v19_v6  }
   0xc   :  { %144 = vperm.xlu0 %206, %v22_v8  }
   0xf   :  { %203 = vmatmul.mubr.msk.bf16.gmra.mrb[4].mxu0 %vm69_vm0, %v212_v9 }
  0x82   :  { %v42_v19 = vpop.permute.xlu1 %41 }
  0x83   :  { %v32_v10 = vpop.permute.xlu0 %31 }
  0x86   :  { %v47_v30 = vpop.permute.xlu1 %46 }
  0x87   :  { %v37_v14 = vpop.permute.xlu0 %36 }
  0x8b   :  { %v145_v43 = vpop.permute.xlu0 %144 }
  0xda   :  { %v110_v11 = vpop.f32.mrb[0].mxu0 }
  0xdb   :  { %v111_v12 = vadd.f32 %v110_v11, %v32_v10  ;;  %v112_v13 = vpop.f32.mrb[1].mxu0 }
  0xdc   :  { %v113_v15 = vadd.f32 %v112_v13, %v32_v10  ;;  %v114_v16 = vpop.f32.mrb[2].mxu0 }
  0xdd   :  { %v115_v17 = vadd.f32 %v114_v16, %v37_v14  ;;  %v116_v18 = vpop.f32.mrb[3].mxu0  ;;  %v129_v21 = vmax.f32 %v111_v12, 0.0 }
  0xde   :  { %v117_v20 = vadd.f32 %v116_v18, %v37_v14  ;;  %v130_v23 = vmax.f32 %v113_v15, 0.0 }
  0xdf   :  { %v131_v22 = vmax.f32 %v115_v17, 0.0 }
  0xe0   :  { %v132_v24 = vmax.f32 %v117_v20, 0.0 }
  0xe1   :  { %v138_v25 = vpack.c.bf16 %v131_v22, %v129_v21 }
  0xe2   :  { %v120_v26 = vpop.f32.mrb[4].mxu0  ;;  %v139_v27 = vpack.c.bf16 %v132_v24, %v130_v23 }
  0xe3   :  { %v121_v28 = vadd.f32 %v120_v26, %v42_v19  ;;  %v122_v29 = vpop.f32.mrb[5].mxu0 }
  0xe4   :  { %v123_v31 = vadd.f32 %v122_v29, %v42_v19  ;;  %v124_v32 = vpop.f32.mrb[6].mxu0  ;;  %151 = vmatprep.subr.bf16.mxu1 %v139_v27 }
  0xe5   :  { %v125_v33 = vadd.f32 %v124_v32, %v47_v30  ;;  %v126_v34 = vpop.f32.mrb[7].mxu0  ;;  %152 = vmatpush1.bf16.msra.mxu1 %v138_v25  ;;  %v133_v36 = vmax.f32 %v121_v28, 0.0 }
  0xe6   :  { %v127_v35 = vadd.f32 %v126_v34, %v47_v30  ;;  %v134_v38 = vmax.f32 %v123_v31, 0.0 }
  0xe7   :  { %v135_v37 = vmax.f32 %v125_v33, 0.0 }
  0xe8   :  { %v136_v39 = vmax.f32 %v127_v35, 0.0 }
  0xe9   :  { %v140_v40 = vpack.c.bf16 %v135_v37, %v133_v36 }
  0xea   :  { %v141_v41 = vpack.c.bf16 %v136_v39, %v134_v38 }
  0xec   :  { %153 = vmatprep.subr.bf16.mxu1 %v141_v41 }
  0xed   :  { %154 = vmatpush1.bf16.msra.mxu1 %v140_v40 }
  0xf0   :  { %204 = vmatmul.mubr.msk.bf16.vlgmr.msra.gmra.mrb[0].mxu1 %vm147_vm1, %v137_v42 }
 0x1c3   :  { %v185_v44 = vpop.f32.mrb[0].mxu1 }
 0x1c4   :  { %v186_v45 = vadd.f32 %v185_v44, %v145_v43  ;;  %v187_v46 = vpop.f32.mrb[1].mxu1 }
 0x1c5   :  { %v188_v47 = vadd.f32 %v187_v46, %v145_v43  ;;  %v189_v48 = vpop.f32.mrb[2].mxu1 }
 0x1c6   :  { %192 = vst [vmem:[%s279_s4] sm:$0xff] %v186_v45  ;;  %v190_v49 = vpop.f32.mrb[3].mxu1 }
 0x1c7   :  { %193 = vst [vmem:[%s279_s4 + $0x8] sm:$0xff] %v188_v47 }

</bundles_post_ra>
